<compile_context>
chip_gen: v6e
topology: v6e:2x2x1
jax: 0.10.0
libtpu: 0.0.40
codegen_flags: <defaults>
</compile_context>

<pallas_src>
import functools

import jax
import jax.numpy as jnp
from jax.experimental import pallas as pl
from jax.experimental.pallas import tpu as pltpu


def _dwconv_kernel(xc_ref, xt_ref, xb_ref, w_ref, b_ref, o_ref, *, TH, W):
    # xc_ref: (TH, W, Cp)  center rows (unpadded input rows of this tile)
    # xt_ref: (1,  W, Cp)  row just above the tile (clamped at the border)
    # xb_ref: (1,  W, Cp)  row just below the tile (clamped at the border)
    # w_ref : (3, 3, Cp)   depthwise taps, channel-last
    # b_ref : (1, Cp)      per-channel bias
    # o_ref : (TH, W, Cp)  output rows
    h = pl.program_id(1)
    nh = pl.num_programs(1)
    f32 = jnp.float32

    # Single upcast per element; halo rows selected to zero outside the image
    # (select, not multiply, so NaN/Inf in the clamped row cannot propagate).
    center = xc_ref[...].astype(f32)
    top = jnp.where(h > 0, xt_ref[...].astype(f32), 0.0)
    bot = jnp.where(h < nh - 1, xb_ref[...].astype(f32), 0.0)
    slab = jnp.concatenate([top, center, bot], axis=0)      # (TH + 2, W, Cp) f32

    w = w_ref[...].astype(f32)                               # (3, 3, Cp)
    b = b_ref[...].astype(f32)                               # (1, Cp)

    # Per-column-offset vertical sums on the UNSHIFTED slab:
    #   r_dx[i, j] = sum_dy w[dy, dx] * slab[i + dy, j]
    def vsum(dx, extra=None):
        acc = slab[0:TH] * w[0, dx, :]
        if extra is not None:
            acc = acc + extra
        acc = acc + slab[1:TH + 1] * w[1, dx, :]
        acc = acc + slab[2:TH + 2] * w[2, dx, :]
        return acc

    r0 = vsum(0)                    # contributes to out[:, j] from column j-1
    r1 = vsum(1, extra=b[0, :])     # same column; bias folded into the seed
    r2 = vsum(2)                    # contributes to out[:, j] from column j+1

    # One-column shift with zero boundary (conv padding=1 along W).  Only the
    # two TH-row f32 results are shifted -- no full-slab shifted copies.
    # TODO(synk): pltpu.roll(axis=1) on the XLU would make these shifts ~free.
    cp = slab.shape[-1]
    zcol = jnp.zeros((TH, 1, cp), f32)
    r0s = jnp.concatenate([zcol, r0[:, :W - 1, :]], axis=1)   # x[j-1] taps
    r2s = jnp.concatenate([r2[:, 1:, :], zcol], axis=1)       # x[j+1] taps

    o_ref[...] = (r1 + r0s + r2s).astype(o_ref.dtype)


def _default_vmem_bytes():
    """(budget for tile sizing, scoped vmem limit), keyed off the device."""
    cap = None
    try:
        cap = pltpu.get_tpu_info().vmem_capacity_bytes
    except Exception:
        cap = None
    if cap is not None and cap >= (100 << 20):
        # v5e / v6e: 128 MiB physical VMEM -- use it for big tiles / big DMAs.
        return 48 << 20, 96 << 20
    # v7x (64 MiB per TensorCore) or unknown: stay conservative.
    return 24 << 20, 48 << 20


def _pick_tile_h(H, W, Cp, itemsize, budget_bytes):
    """Largest row-tile whose pipelined working set fits the VMEM budget.

    Accounts for double-buffered input/output slabs plus the in-kernel f32
    temporaries (slab, three vertical sums, two shifted variants).  Prefers an
    exact divisor of H when it is not much smaller than the VMEM-limited tile;
    otherwise the caller pads H up (ceil grid)."""
    row_in = W * Cp * itemsize
    row_f32 = W * Cp * 4

    def fits(th):
        dma = 2 * ((th + 2) * row_in + th * row_in)       # double-buffered in + out
        tmp = (th + 2 + 6 * th) * row_f32                 # f32 slab + sums + shifts
        return dma + tmp <= budget_bytes

    best = 1
    for th in range(1, H + 1):
        if fits(th):
            best = th
    if best >= H:
        return H
    best_div = max((d for d in range(1, best + 1) if H % d == 0), default=1)
    if best_div >= max(8, best // 2):
        return best_div
    return best


def dwconv_forward(x, weight, bias, H, W, *, tile_h=None,
                   vmem_budget_bytes=None, vmem_limit_bytes=None):
    """x: (B, N, C) with N == H*W (row-major spatial).
    weight: (3, 3, C) channel-last depthwise taps (torch w[c,0,ky,kx] -> [ky,kx,c]).
    bias: (C,).  Returns (B, N, C), matching DWConv.forward."""
    B, N, C = x.shape
    assert N == H * W
    assert weight.shape == (3, 3, C)
    assert bias.shape == (C,)

    auto_budget, auto_limit = _default_vmem_bytes()
    if vmem_budget_bytes is None:
        vmem_budget_bytes = auto_budget
    if vmem_limit_bytes is None:
        vmem_limit_bytes = auto_limit

    # Lane-dense channels (x128), sublane-dense width (x8).  No-op for typical
    # UKAN widths; only pads tiny / awkward shapes.
    Cp = ((C + 127) // 128) * 128
    Wp = ((W + 7) // 8) * 8

    if tile_h is None:
        tile_h = _pick_tile_h(H, Wp, Cp, x.dtype.itemsize, vmem_budget_bytes)
    tile_h = max(1, min(tile_h, H))
    Hp = ((H + tile_h - 1) // tile_h) * tile_h
    nh = Hp // tile_h

    x_nhwc = x.reshape(B, H, W, C)
    pad_h, pad_w, pad_c = Hp - H, Wp - W, Cp - C
    if pad_h or pad_w or pad_c:
        # Zero padding reproduces the conv's zero border exactly; padded output
        # rows/cols/channels are sliced off below.
        x_nhwc = jnp.pad(x_nhwc, ((0, 0), (0, pad_h), (0, pad_w), (0, pad_c)))
    if pad_c:
        weight = jnp.pad(weight, ((0, 0), (0, 0), (0, pad_c)))
        bias = jnp.pad(bias, ((0, pad_c),))
    bias2d = bias.reshape(1, Cp)

    kernel = functools.partial(_dwconv_kernel, TH=tile_h, W=Wp)

    flops = 18 * B * Hp * Wp * Cp
    bytes_accessed = 2 * B * Hp * Wp * Cp * x.dtype.itemsize

    out = pl.pallas_call(
        kernel,
        out_shape=jax.ShapeDtypeStruct((B, Hp, Wp, Cp), x.dtype),
        grid_spec=pltpu.PrefetchScalarGridSpec(
            num_scalar_prefetch=0,
            grid=(B, nh),
            in_specs=[
                # center row slab (batch dim squeezed out of the kernel ref)
                pl.BlockSpec((pl.Squeezed(), tile_h, Wp, Cp),
                             lambda b, h: (b, h, 0, 0)),
                # single halo row above (block size 1 on H -> element index),
                # clamped at the top border (zeroed by select in the kernel)
                pl.BlockSpec((pl.Squeezed(), 1, Wp, Cp),
                             lambda b, h: (b, jnp.maximum(h * tile_h - 1, 0), 0, 0)),
                # single halo row below, clamped at the bottom border
                pl.BlockSpec((pl.Squeezed(), 1, Wp, Cp),
                             lambda b, h: (b, jnp.minimum((h + 1) * tile_h, Hp - 1), 0, 0)),
                pl.BlockSpec((3, 3, Cp), lambda b, h: (0, 0, 0)),
                pl.BlockSpec((1, Cp), lambda b, h: (0, 0)),
            ],
            out_specs=pl.BlockSpec((pl.Squeezed(), tile_h, Wp, Cp),
                                   lambda b, h: (b, h, 0, 0)),
        ),
        compiler_params=pltpu.CompilerParams(
            dimension_semantics=("parallel", "parallel"),
            vmem_limit_bytes=vmem_limit_bytes),
        cost_estimate=pl.CostEstimate(
            flops=flops, transcendentals=0, bytes_accessed=bytes_accessed),
    )(x_nhwc, x_nhwc, x_nhwc, weight, bias2d)

    if pad_h or pad_w or pad_c:
        out = out[:, :H, :W, :C]
    # (B, H, W, C) -> (B, N, C), matches x.flatten(2).transpose(1, 2)
    return out.reshape(B, N, C)


def _reference(x, weight, bias, H, W):
    """Pure-JAX reference (equivalent to the torch depthwise conv path)."""
    B, N, C = x.shape
    x_nhwc = x.reshape(B, H, W, C)
    x_pad = jnp.pad(x_nhwc, ((0, 0), (1, 1), (1, 1), (0, 0)))
    out = jnp.zeros((B, H, W, C), jnp.float32)
    for dy in range(3):
        for dx in range(3):
            out = out + x_pad[:, dy:dy + H, dx:dx + W, :].astype(jnp.float32) \
                * weight[dy, dx, :].astype(jnp.float32)
    out = out + bias.astype(jnp.float32)
    return out.astype(x.dtype).reshape(B, N, C)


if __name__ == "__main__":
    key = jax.random.PRNGKey(0)

    # ---- shape 1: divisible everything, forced 2 row tiles (halo path) ----
    B, C, Hs, Ws = 2, 4, 16, 16
    N = Hs * Ws
    kx, kw, kb = jax.random.split(key, 3)
    x = jax.random.normal(kx, (B, N, C), dtype=jnp.float32)
    # nn.Conv2d(dim, dim, 3, groups=dim) weight has shape (dim, 1, 3, 3);
    # stored channel-last as (3, 3, dim) for the NHWC kernel.
    weight = jax.random.normal(kw, (3, 3, C), dtype=jnp.float32) * 0.1
    bias = jax.random.normal(kb, (C,), dtype=jnp.float32) * 0.1

    out_tiled = dwconv_forward(x, weight, bias, Hs, Ws, tile_h=8)
    out_auto = dwconv_forward(x, weight, bias, Hs, Ws)
    jax.block_until_ready((out_tiled, out_auto))

    ref = _reference(x, weight, bias, Hs, Ws)
    assert out_tiled.shape == (B, N, C)
    assert jnp.allclose(out_tiled, ref, atol=1e-5, rtol=1e-5)
    assert jnp.allclose(out_auto, ref, atol=1e-5, rtol=1e-5)

    # ---- shape 2: awkward H (not a multiple of tile_h) and W (not x8) ----
    H2, W2 = 10, 12
    N2 = H2 * W2
    k2x, k2w, k2b = jax.random.split(jax.random.PRNGKey(1), 3)
    x2 = jax.random.normal(k2x, (B, N2, C), dtype=jnp.float32)
    w2 = jax.random.normal(k2w, (3, 3, C), dtype=jnp.float32) * 0.1
    b2 = jax.random.normal(k2b, (C,), dtype=jnp.float32) * 0.1

    out2 = dwconv_forward(x2, w2, b2, H2, W2, tile_h=4)   # Hp=12, Wp=16 padding path
    jax.block_until_ready(out2)
    ref2 = _reference(x2, w2, b2, H2, W2)
    assert out2.shape == (B, N2, C)
    assert jnp.allclose(out2, ref2, atol=1e-5, rtol=1e-5)

    print("KERNEL_OK")
</pallas_src>

<mosaic_0001>
module attributes {stable_mosaic.version = 11 : i64} {
  func.func @_dwconv_kernel(%arg0: i32, %arg1: i32, %arg2: memref<1x8x16x128xf32, #tpu.memory_space<vmem>>, %arg3: memref<1x1x16x128xf32, #tpu.memory_space<vmem>>, %arg4: memref<1x1x16x128xf32, #tpu.memory_space<vmem>>, %arg5: memref<3x3x128xf32, #tpu.memory_space<vmem>>, %arg6: memref<1x128xf32, #tpu.memory_space<vmem>>, %arg7: memref<1x8x16x128xf32, #tpu.memory_space<vmem>>) attributes {dimension_semantics = [#tpu.dimension_semantics<parallel>, #tpu.dimension_semantics<parallel>], iteration_bounds = array<i64: 2, 2>, scalar_prefetch = 0 : i64, scratch_operands = 0 : i64, tpu.core_type = #tpu.core_type<tc>, window_params = [{transform_indices = @transform_0, window_bounds = array<i64: 1, 8, 16, 128>}, {transform_indices = @transform_1, window_bounds = array<i64: 1, 1, 16, 128>}, {transform_indices = @transform_2, window_bounds = array<i64: 1, 1, 16, 128>}, {pipeline_mode = #tpu.pipeline_mode<synchronous>, transform_indices = @transform_3, window_bounds = array<i64: 3, 3, 128>}, {pipeline_mode = #tpu.pipeline_mode<synchronous>, transform_indices = @transform_4, window_bounds = array<i64: 1, 128>}, {transform_indices = @transform_5, window_bounds = array<i64: 1, 8, 16, 128>}]} {
    %c0 = arith.constant 0 : index
    %c0_0 = arith.constant 0 : index
    %c0_1 = arith.constant 0 : index
    %c0_2 = arith.constant 0 : index
    %0 = vector.load %arg2[%c0, %c0_0, %c0_1, %c0_2] : memref<1x8x16x128xf32, #tpu.memory_space<vmem>>, vector<1x8x16x128xf32>
    %1 = vector.shape_cast %0 : vector<1x8x16x128xf32> to vector<8x16x128xf32>
    %c0_i32 = arith.constant 0 : i32
    %2 = arith.cmpi sgt, %arg1, %c0_i32 : i32
    %c0_3 = arith.constant 0 : index
    %c0_4 = arith.constant 0 : index
    %c0_5 = arith.constant 0 : index
    %c0_6 = arith.constant 0 : index
    %3 = vector.load %arg3[%c0_3, %c0_4, %c0_5, %c0_6] : memref<1x1x16x128xf32, #tpu.memory_space<vmem>>, vector<1x1x16x128xf32>
    %4 = vector.shape_cast %3 : vector<1x1x16x128xf32> to vector<1x16x128xf32>
    %cst = arith.constant 0.000000e+00 : f32
    %5 = vector.broadcast %cst : f32 to vector<1x16x128xf32>
    %6 = arith.select %2, %4, %5 : vector<1x16x128xf32>
    %c1_i32 = arith.constant 1 : i32
    %7 = arith.cmpi slt, %arg1, %c1_i32 : i32
    %c0_7 = arith.constant 0 : index
    %c0_8 = arith.constant 0 : index
    %c0_9 = arith.constant 0 : index
    %c0_10 = arith.constant 0 : index
    %8 = vector.load %arg4[%c0_7, %c0_8, %c0_9, %c0_10] : memref<1x1x16x128xf32, #tpu.memory_space<vmem>>, vector<1x1x16x128xf32>
    %9 = vector.shape_cast %8 : vector<1x1x16x128xf32> to vector<1x16x128xf32>
    %cst_11 = arith.constant 0.000000e+00 : f32
    %10 = vector.broadcast %cst_11 : f32 to vector<1x16x128xf32>
    %11 = arith.select %7, %9, %10 : vector<1x16x128xf32>
    %12 = tpu.concatenate %6, %1, %11 in 0 : vector<1x16x128xf32>, vector<8x16x128xf32>, vector<1x16x128xf32> -> vector<10x16x128xf32>
    %c0_12 = arith.constant 0 : index
    %c0_13 = arith.constant 0 : index
    %c0_14 = arith.constant 0 : index
    %13 = vector.load %arg5[%c0_12, %c0_13, %c0_14] : memref<3x3x128xf32, #tpu.memory_space<vmem>>, vector<3x3x128xf32>
    %c0_15 = arith.constant 0 : index
    %c0_16 = arith.constant 0 : index
    %14 = vector.load %arg6[%c0_15, %c0_16] : memref<1x128xf32, #tpu.memory_space<vmem>>, vector<1x128xf32>
    %15 = vector.extract_strided_slice %12 {offsets = [0, 0, 0], sizes = [8, 16, 128], strides = [1, 1, 1]} : vector<10x16x128xf32> to vector<8x16x128xf32>
    %16 = vector.extract_strided_slice %13 {offsets = [0, 0, 0], sizes = [1, 1, 128], strides = [1, 1, 1]} : vector<3x3x128xf32> to vector<1x1x128xf32>
    %17 = vector.shape_cast %16 : vector<1x1x128xf32> to vector<128xf32>
    %18 = vector.shape_cast %17 : vector<128xf32> to vector<1x1x128xf32>
    %19 = vector.broadcast %18 : vector<1x1x128xf32> to vector<8x16x128xf32>
    %20 = arith.mulf %15, %19 : vector<8x16x128xf32>
    %21 = vector.extract_strided_slice %12 {offsets = [1, 0, 0], sizes = [8, 16, 128], strides = [1, 1, 1]} : vector<10x16x128xf32> to vector<8x16x128xf32>
    %22 = vector.extract_strided_slice %13 {offsets = [1, 0, 0], sizes = [1, 1, 128], strides = [1, 1, 1]} : vector<3x3x128xf32> to vector<1x1x128xf32>
    %23 = vector.shape_cast %22 : vector<1x1x128xf32> to vector<128xf32>
    %24 = vector.shape_cast %23 : vector<128xf32> to vector<1x1x128xf32>
    %25 = vector.broadcast %24 : vector<1x1x128xf32> to vector<8x16x128xf32>
    %26 = arith.mulf %21, %25 : vector<8x16x128xf32>
    %27 = arith.addf %20, %26 : vector<8x16x128xf32>
    %28 = vector.extract_strided_slice %12 {offsets = [2, 0, 0], sizes = [8, 16, 128], strides = [1, 1, 1]} : vector<10x16x128xf32> to vector<8x16x128xf32>
    %29 = vector.extract_strided_slice %13 {offsets = [2, 0, 0], sizes = [1, 1, 128], strides = [1, 1, 1]} : vector<3x3x128xf32> to vector<1x1x128xf32>
    %30 = vector.shape_cast %29 : vector<1x1x128xf32> to vector<128xf32>
    %31 = vector.shape_cast %30 : vector<128xf32> to vector<1x1x128xf32>
    %32 = vector.broadcast %31 : vector<1x1x128xf32> to vector<8x16x128xf32>
    %33 = arith.mulf %28, %32 : vector<8x16x128xf32>
    %34 = arith.addf %27, %33 : vector<8x16x128xf32>
    %35 = vector.shape_cast %14 : vector<1x128xf32> to vector<128xf32>
    %36 = vector.extract_strided_slice %12 {offsets = [0, 0, 0], sizes = [8, 16, 128], strides = [1, 1, 1]} : vector<10x16x128xf32> to vector<8x16x128xf32>
    %37 = vector.extract_strided_slice %13 {offsets = [0, 1, 0], sizes = [1, 1, 128], strides = [1, 1, 1]} : vector<3x3x128xf32> to vector<1x1x128xf32>
    %38 = vector.shape_cast %37 : vector<1x1x128xf32> to vector<128xf32>
    %39 = vector.shape_cast %38 : vector<128xf32> to vector<1x1x128xf32>
    %40 = vector.broadcast %39 : vector<1x1x128xf32> to vector<8x16x128xf32>
    %41 = arith.mulf %36, %40 : vector<8x16x128xf32>
    %42 = vector.shape_cast %35 : vector<128xf32> to vector<1x1x128xf32>
    %43 = vector.broadcast %42 : vector<1x1x128xf32> to vector<8x16x128xf32>
    %44 = arith.addf %41, %43 : vector<8x16x128xf32>
    %45 = vector.extract_strided_slice %12 {offsets = [1, 0, 0], sizes = [8, 16, 128], strides = [1, 1, 1]} : vector<10x16x128xf32> to vector<8x16x128xf32>
    %46 = vector.extract_strided_slice %13 {offsets = [1, 1, 0], sizes = [1, 1, 128], strides = [1, 1, 1]} : vector<3x3x128xf32> to vector<1x1x128xf32>
    %47 = vector.shape_cast %46 : vector<1x1x128xf32> to vector<128xf32>
    %48 = vector.shape_cast %47 : vector<128xf32> to vector<1x1x128xf32>
    %49 = vector.broadcast %48 : vector<1x1x128xf32> to vector<8x16x128xf32>
    %50 = arith.mulf %45, %49 : vector<8x16x128xf32>
    %51 = arith.addf %44, %50 : vector<8x16x128xf32>
    %52 = vector.extract_strided_slice %12 {offsets = [2, 0, 0], sizes = [8, 16, 128], strides = [1, 1, 1]} : vector<10x16x128xf32> to vector<8x16x128xf32>
    %53 = vector.extract_strided_slice %13 {offsets = [2, 1, 0], sizes = [1, 1, 128], strides = [1, 1, 1]} : vector<3x3x128xf32> to vector<1x1x128xf32>
    %54 = vector.shape_cast %53 : vector<1x1x128xf32> to vector<128xf32>
    %55 = vector.shape_cast %54 : vector<128xf32> to vector<1x1x128xf32>
    %56 = vector.broadcast %55 : vector<1x1x128xf32> to vector<8x16x128xf32>
    %57 = arith.mulf %52, %56 : vector<8x16x128xf32>
    %58 = arith.addf %51, %57 : vector<8x16x128xf32>
    %59 = vector.extract_strided_slice %12 {offsets = [0, 0, 0], sizes = [8, 16, 128], strides = [1, 1, 1]} : vector<10x16x128xf32> to vector<8x16x128xf32>
    %60 = vector.extract_strided_slice %13 {offsets = [0, 2, 0], sizes = [1, 1, 128], strides = [1, 1, 1]} : vector<3x3x128xf32> to vector<1x1x128xf32>
    %61 = vector.shape_cast %60 : vector<1x1x128xf32> to vector<128xf32>
    %62 = vector.shape_cast %61 : vector<128xf32> to vector<1x1x128xf32>
    %63 = vector.broadcast %62 : vector<1x1x128xf32> to vector<8x16x128xf32>
    %64 = arith.mulf %59, %63 : vector<8x16x128xf32>
    %65 = vector.extract_strided_slice %12 {offsets = [1, 0, 0], sizes = [8, 16, 128], strides = [1, 1, 1]} : vector<10x16x128xf32> to vector<8x16x128xf32>
    %66 = vector.extract_strided_slice %13 {offsets = [1, 2, 0], sizes = [1, 1, 128], strides = [1, 1, 1]} : vector<3x3x128xf32> to vector<1x1x128xf32>
    %67 = vector.shape_cast %66 : vector<1x1x128xf32> to vector<128xf32>
    %68 = vector.shape_cast %67 : vector<128xf32> to vector<1x1x128xf32>
    %69 = vector.broadcast %68 : vector<1x1x128xf32> to vector<8x16x128xf32>
    %70 = arith.mulf %65, %69 : vector<8x16x128xf32>
    %71 = arith.addf %64, %70 : vector<8x16x128xf32>
    %72 = vector.extract_strided_slice %12 {offsets = [2, 0, 0], sizes = [8, 16, 128], strides = [1, 1, 1]} : vector<10x16x128xf32> to vector<8x16x128xf32>
    %73 = vector.extract_strided_slice %13 {offsets = [2, 2, 0], sizes = [1, 1, 128], strides = [1, 1, 1]} : vector<3x3x128xf32> to vector<1x1x128xf32>
    %74 = vector.shape_cast %73 : vector<1x1x128xf32> to vector<128xf32>
    %75 = vector.shape_cast %74 : vector<128xf32> to vector<1x1x128xf32>
    %76 = vector.broadcast %75 : vector<1x1x128xf32> to vector<8x16x128xf32>
    %77 = arith.mulf %72, %76 : vector<8x16x128xf32>
    %78 = arith.addf %71, %77 : vector<8x16x128xf32>
    %cst_17 = arith.constant 0.000000e+00 : f32
    %79 = vector.broadcast %cst_17 : f32 to vector<8x1x128xf32>
    %80 = vector.extract_strided_slice %34 {offsets = [0, 0, 0], sizes = [8, 15, 128], strides = [1, 1, 1]} : vector<8x16x128xf32> to vector<8x15x128xf32>
    %81 = tpu.concatenate %79, %80 in 1 : vector<8x1x128xf32>, vector<8x15x128xf32> -> vector<8x16x128xf32>
    %82 = vector.extract_strided_slice %78 {offsets = [0, 1, 0], sizes = [8, 15, 128], strides = [1, 1, 1]} : vector<8x16x128xf32> to vector<8x15x128xf32>
    %83 = tpu.concatenate %82, %79 in 1 : vector<8x15x128xf32>, vector<8x1x128xf32> -> vector<8x16x128xf32>
    %84 = arith.addf %58, %81 : vector<8x16x128xf32>
    %85 = arith.addf %84, %83 : vector<8x16x128xf32>
    %c0_18 = arith.constant 0 : index
    %c0_19 = arith.constant 0 : index
    %c0_20 = arith.constant 0 : index
    %c0_21 = arith.constant 0 : index
    %86 = vector.load %arg7[%c0_18, %c0_19, %c0_20, %c0_21] : memref<1x8x16x128xf32, #tpu.memory_space<vmem>>, vector<1x8x16x128xf32>
    %87 = vector.shape_cast %86 : vector<1x8x16x128xf32> to vector<8x16x128xf32>
    %88 = vector.shape_cast %85 : vector<8x16x128xf32> to vector<1x8x16x128xf32>
    tpu.vector_store %arg7[%c0_18, %c0_19, %c0_20, %c0_21], %88 {strides = array<i32>} : memref<1x8x16x128xf32, #tpu.memory_space<vmem>>, vector<1x8x16x128xf32>,
    return
  }
  func.func @transform_0(%arg0: i32, %arg1: i32) -> (i32, i32, i32, i32) {
    %c0_i32 = arith.constant 0 : i32
    %c0_i32_0 = arith.constant 0 : i32
    %c0_i32_1 = arith.constant 0 : i32
    return %arg0, %arg1, %c0_i32, %c0_i32_0 : i32, i32, i32, i32
  }
  func.func @transform_1(%arg0: i32, %arg1: i32) -> (i32, i32, i32, i32) {
    %c8_i32 = arith.constant 8 : i32
    %0 = arith.muli %arg1, %c8_i32 : i32
    %c1_i32 = arith.constant 1 : i32
    %1 = arith.subi %0, %c1_i32 : i32
    %c0_i32 = arith.constant 0 : i32
    %2 = arith.maxsi %1, %c0_i32 : i32
    %c0_i32_0 = arith.constant 0 : i32
    %c0_i32_1 = arith.constant 0 : i32
    %c0_i32_2 = arith.constant 0 : i32
    return %arg0, %2, %c0_i32_0, %c0_i32_1 : i32, i32, i32, i32
  }
  func.func @transform_2(%arg0: i32, %arg1: i32) -> (i32, i32, i32, i32) {
    %c1_i32 = arith.constant 1 : i32
    %0 = arith.addi %arg1, %c1_i32 : i32
    %c8_i32 = arith.constant 8 : i32
    %1 = arith.muli %0, %c8_i32 : i32
    %c15_i32 = arith.constant 15 : i32
    %2 = arith.minsi %1, %c15_i32 : i32
    %c0_i32 = arith.constant 0 : i32
    %c0_i32_0 = arith.constant 0 : i32
    %c0_i32_1 = arith.constant 0 : i32
    return %arg0, %2, %c0_i32, %c0_i32_0 : i32, i32, i32, i32
  }
  func.func @transform_3(%arg0: i32, %arg1: i32) -> (i32, i32, i32) {
    %c0_i32 = arith.constant 0 : i32
    %c0_i32_0 = arith.constant 0 : i32
    %c0_i32_1 = arith.constant 0 : i32
    %c0_i32_2 = arith.constant 0 : i32
    return %c0_i32, %c0_i32_0, %c0_i32_1 : i32, i32, i32
  }
  func.func @transform_4(%arg0: i32, %arg1: i32) -> (i32, i32) {
    %c0_i32 = arith.constant 0 : i32
    %c0_i32_0 = arith.constant 0 : i32
    %c0_i32_1 = arith.constant 0 : i32
    return %c0_i32, %c0_i32_0 : i32, i32
  }
  func.func @transform_5(%arg0: i32, %arg1: i32) -> (i32, i32, i32, i32) {
    %c0_i32 = arith.constant 0 : i32
    %c0_i32_0 = arith.constant 0 : i32
    %c0_i32_1 = arith.constant 0 : i32
    return %arg0, %arg1, %c0_i32, %c0_i32_0 : i32, i32, i32, i32
  }
}

</mosaic_0001>

<bundles_post_ra>
// kernel: tpu_custom_call.1
= control target key start
LH: loop header
LB: loop body
LE: loop exit
PB: predicated region body
PF: predicated region fallthrough
CT: control target
= control target key end

     0   :  { %s2401_s0 = inlined_call_operand.hbm [shape: f32[2,16,16,128], index: 0, kind: input, shape index: {}]   ;;  %s2402_s1 = inlined_call_operand.hbm [shape: f32[2,16,16,128], index: 1, kind: input, shape index: {}]   ;;  %s2403_s2 = inlined_call_operand.hbm [shape: f32[2,16,16,128], index: 2, kind: input, shape index: {}]   ;;  %s2404_s3 = inlined_call_operand.hbm [shape: f32[3,3,128], index: 3, kind: input, shape index: {}]   ;;  %s2405_s4 = inlined_call_operand.vmem [shape: f32[1,128], index: 4, kind: input, shape index: {}]   ;;  %s2406_s5 = inlined_call_operand.hbm [shape: f32[2,16,16,128], index: 5, kind: output, shape index: {}]  }
   0x1   :  { %2429 = sst [smem:[#allocation31_spill]] %s2401_s0 }
   0x2   :  { %2430 = sst [smem:[#allocation32_spill]] %s2402_s1 }
   0x3   :  { %2431 = sst [smem:[#allocation33_spill]] %s2403_s2 }
   0x4   :  { %2432 = sst [smem:[#allocation34_spill]] %s2404_s3 }
   0x5   :  { %2433 = sst [smem:[#allocation35_spill]] %s2405_s4 }
   0x6   :  { %2434 = sst [smem:[#allocation36_spill]] %s2406_s5 }
   0x7   :  { %10 = vsyncpa [#allocation3], 0 }
   0x8   :  { %12 = vsyncpa [#allocation3 + $0x1], 0 }
   0x9   :  { %13 = vsyncpa [#allocation6], 0 }
   0xa   :  { %15 = vsyncpa [#allocation6 + $0x1], 0 }
   0xb   :  { %16 = vsyncpa [#allocation9], 0 }
   0xc   :  { %17 = vsyncpa [#allocation4], 0 }
   0xd   :  { %19 = vsyncpa [#allocation4 + $0x1], 0  ;;  %s1597_s18 = smov 0   ;;  %s1599_s19 = smov 0  }
   0xe   :  { %s1601_s20 = smov 0   ;;  %s1603_s21 = smov 0  }
   0xf   :  { %s1605_s22 = smov 0   ;;  %s1607_s23 = smov 0  }
  0x10   :  { %s1609_s24 = smov 0   ;;  %s1611_s25 = smov 0  }
  0x11   :  { %s1613_s26 = smov 0   ;;  %s1615_s27 = smov 0  }
  0x12   :  { %s1617_s28 = smov 0   ;;  %s1619_s29 = smov 0  }
  0x13   :  { %s1621_s30 = smov 0   ;;  %s1623_s6 = smov 0  }
  0x14 LB: > { %2435 = sst [smem:[#allocation16_spill]] %s1502_s18  ;;  %s34_s7 = sadd.s32 1, %s1546_s29  ;;  %s1554_s6 = sphi %s1623_s6, %s25_s6   ;;  %s1550_s30 = sphi %s1621_s30, %s2500_s30   ;;  %s1546_s29 = sphi %s1619_s29, %s2499_s29   ;;  %s1542_s28 = sphi %s1617_s28, %s2505_s28   ;;  %s1538_s27 = sphi %s1615_s27, %s2497_s27   ;;  %s1534_s26 = sphi %s1613_s26, %s2496_s26   ;;  %s1530_s25 = sphi %s1611_s25, %s2504_s25   ;;  %s1526_s24 = sphi %s1609_s24, %s2503_s24   ;;  %s1522_s23 = sphi %s1607_s23, %s2494_s23   ;;  %s1518_s22 = sphi %s1605_s22, %s2502_s22   ;;  %s1514_s21 = sphi %s1603_s21, %s2501_s21   ;;  %s1510_s20 = sphi %s1601_s20, %s2521_s20   ;;  %s1506_s19 = sphi %s1599_s19, %s2492_s19   ;;  %s1502_s18 = sphi %s1597_s18, %s2491_s18  }
  0x15   : > { %2436 = sst [smem:[#allocation17_spill]] %s1506_s19  ;;  %s37_s8 = sadd.s32 1, %s1550_s30 }
  0x16   : > { %2437 = sst [smem:[#allocation18_spill]] %s1510_s20  ;;  %p35_p0 = scmp.ge.s32.totalorder %s34_s7, 2 }
  0x17   : > { %2438 = sst [smem:[#allocation19_spill]] %s1522_s23  ;;  %p2417_p1 = scmp.eq.s32.totalorder %s1554_s6, 0 }
  0x18   : > { %2439 = sst [smem:[#allocation20_spill]] %s1534_s26  ;;  %s1076_s9 = sshll.u32 %s1546_s29, 3 }
  0x19   : > { %2440 = sst [smem:[#allocation21_spill]] %s1538_s27  ;;  %s82_s10 = sadd.s32 1, %s1522_s23 }
  0x1a   : > { %2441 = sst [smem:[#allocation22_spill]] %s1542_s28  ;;  %s2507_s7 = smov (%p35_p0, %s34_s7), 0 }
  0x1b   : > { %2442 = sst [smem:[#allocation23_spill]] %s1546_s29  ;;  %s2509_s8 = smov (!%p35_p0, %s37_s8), %s1550_s30 }
  0x1c   : > { %2443 = sst [smem:[#allocation24_spill]] %s1550_s30  ;;  %s42_s11 = ssub.s32 %s1546_s29, %s2507_s7 }
  0x1d   : > { %2444 = sst [smem:[#allocation25_spill]] %s2507_s7  ;;  %s1077_s12 = sadd.s32 4294967295, %s1076_s9 }
  0x1e   : > { %p39_p2 = scmp.ge.s32.totalorder %s2509_s8, 2  ;;  %p71_p3 = scmp.gt.s32.totalorder %s1077_s12, 0 }
  0x1f   : > { %s1078_s13 = sshll.u32 %s2507_s7, 3  ;;  %p89_p4 = scmp.ne.s32.totalorder %s1522_s23, %s1518_s22 }
  0x20   : > { %s2511_s8 = smov (%p39_p2, %s2509_s8), 0  ;;  %s2513_s12 = smov (!%p71_p3, %s1077_s12), 0 }
  0x21   : > { %2445 = sst [smem:[#allocation26_spill]] %s2511_s8  ;;  %s1684_s14 = ssub.s32 %s1550_s30, %s2511_s8 }
  0x22   : > { %2446 = sst [smem:[#allocation27_spill]] %s1684_s14  ;;  %s1079_s15 = sadd.s32 4294967295, %s1078_s13 }
  0x23   : > { %s1687_s16 = sor.u32 %s42_s11, %s1684_s14  ;;  %p75_p5 = scmp.gt.s32.totalorder %s1079_s15, 0 }
  0x24   : > { %p1692_p7 = por %p89_p4, %p2417_p1  ;;  %p95_p8 = scmp.ne.s32.totalorder %s1518_s22, %s1514_s21 }
  0x25   : > { %s2515_s15 = smov (!%p75_p5, %s1079_s15), 0  ;;  %s1698_s8 = sadd.s32 8, %s1076_s9 }
  0x26   : > { %2448 = sst [smem:[#allocation28_spill]] %s1698_s8  ;;  %s78_s7 = ssub.s32 %s2513_s12, %s2515_s15 }
  0x27   : > { %s79_s5 = sor.u32 %s78_s7, %s1684_s14  ;;  %s1702_s11 = sadd.s32 8, %s1078_s13 }
  0x28   : > { %p80_p10 = scmp.eq.s32.totalorder %s79_s5, 0  ;;  %p2416_p12 = scmp.lt.s32.totalorder %s1554_s6, 4 }
  0x29   : > { %s1710_s4 = sshll.u32 %s1550_s30, 5  ;;  %s265_s27 = sand.u32 1, %s1554_s6  }
  0x2a   : > { %s1707_s28 = scalar_select %p80_p10, %s1522_s23, %s82_s10  }
  0x2b   : > { %s267_s9 = sand.u32 1, %s1522_s23   ;;  %s1093_s18 = sshll.u32 %s2513_s12, 1 }
  0x2c   : > { %2449 = sst [smem:[#allocation29_spill]] %s1707_s28  ;;  %s1090_s2 = sshll.u32 %s267_s9, 4 }
  0x2d   : > { %s279_s15 = sadd.s32 %s1093_s18, %s1710_s4  ;;  %s269_s7 = scalar_lea.vmem [#allocation5], %s1090_s2 }
  0x2e   : > { %s1095_s19 = sshll.u32 %s279_s15, 7  ;;  %s282_s13 = sshll.u32 %s269_s7, 4  ;;  %s283_s13 = int_to_ptr.vmem [resolvable:$true] %s282_s13 }
  0x2f   : > { %s2450_s1 = sld [smem:[#allocation32_spill]]  ;;  %p1722_p13 = pnand %p2416_p12, %p1692_p7 }
  0x30   : > { %s1726_s10 = scalar_lea.sflag [#allocation6], %s265_s27  ;;  %s1301_s18 = scalar_lea.vmem %s283_s13, 256 }
  0x31   : > { %p1290_p0 = pneg %p1722_p13  ;;  %p1302_p2 = scmp.ne.s32.totalorder %s283_s13, %s1301_s18 }
  0x32   : > { %s1556_s2 = smov [#allocation5]  }
  0x33   : > { %p1304_p3 = pnand %p1302_p2, %p1290_p0  ;;  %s1306_s12 = sshll.u32 %s1556_s2, 4  ;;  %s1307_s12 = int_to_ptr.vmem [resolvable:$false] %s1306_s12 }
  0x34   : > { %p1309_p5 = scmp.lt.s32.totalorder %s283_s13, %s1307_s12 }
  0x35   : > { %s281_s20 = scalar_lea.hbm %s2450_s1, %s1095_s19  ;;  %p1305_p4 = pneg %p1304_p3 }
  0x36   : > { %s1308_s19 = scalar_lea.vmem %s1307_s12, 512 }
  0x37   : > { %p1310_p10 = scmp.lt.s32.totalorder %s1308_s19, %s1301_s18 }
  0x39   : > { %p1311_p11 = por %p1310_p10, %p1309_p5 }
  0x3b   : > { %p1312_p7 = pnand %p1311_p11, %p1305_p4 }
  0x3d   : > { %1315 = shalt.err (!%p1312_p7)
}
  0x3e   : > { %s2418_s8 = smov 128   ;;  %s2420_s27 = smov 8  }
  0x3f   : > { %1145 = dma.hbm_to_vmem [thread:$0]  (!%p1722_p13), %s281_s20, 256, %s283_s13, %s1726_s10, %s2418_s8, %s2418_s8, %s2420_s27  }
  0x40   : > { %s1737_s14 = sadd.s32 4294967295, %s1554_s6   ;;  %p1082_p11 = scmp.ge.s32.totalorder %s1554_s6, 1 }
  0x41   : > { %p2423_p0 = scmp.eq.s32.totalorder %s1737_s14, 0  ;;  %p212_p3 = scmp.lt.s32.totalorder %s1554_s6, 5 }
  0x42   : > { %s1559_s20 = smov [#allocation8]  }
  0x43   : > { %p1748_p4 = por %p95_p8, %p2423_p0  ;;  %p1752_p5 = pnand %p1082_p11, %p212_p3 }
  0x44   : > { %s224_s15 = sshll.u32 %s1559_s20, 4  ;;  %s225_s15 = int_to_ptr.vmem [resolvable:$true] %s224_s15 }
  0x45   : > { %p1135_p13 = pneg %p1752_p5  ;;  %s1327_s7 = scalar_lea.vmem %s225_s15, 192 }
  0x46   : > { %p1328_p9 = scmp.ne.s32.totalorder %s225_s15, %s1327_s7  ;;  %p1335_p2 = scmp.lt.s32.totalorder %s225_s15, %s225_s15 }
  0x47   : > { %p1136_p10 = pnand %p1135_p13, %p2423_p0  ;;  %p1336_p1 = scmp.lt.s32.totalorder %s1327_s7, %s1327_s7 }
  0x49   : > { %p1318_p7 = pneg %p1136_p10  ;;  %p1337_p6 = por %p1336_p1, %p1335_p2 }
  0x4b   : > { %p1330_p12 = pnand %p1328_p9, %p1318_p7 }
  0x4d   : > { %p1331_p8 = pneg %p1330_p12 }
  0x4f   : > { %p1338_p11 = pnand %p1337_p6, %p1331_p8 }
  0x51   : > { %1341 = shalt.err (!%p1338_p11)
}
  0x52   : > { %s1560_s21 = smov 64   ;;  %s1561_s13 = smov 4  }
  0x53   : > { %s2454_s3 = sld [smem:[#allocation34_spill]]  ;;  %s1075_s2 = sadd.s32 4294967294, %s1554_s6  }
  0x54   : > { %s46_s12 = sadd.s32 1, %s1534_s26  ;;  %p2455_p1 = scmp.eq.s32.totalorder %s1687_s16, 0 }
  0x55   : > { %p53_p6 = scmp.ne.s32.totalorder %s1534_s26, %s1530_s25  ;;  %p59_p9 = scmp.ne.s32.totalorder %s1530_s25, %s1526_s24 }
  0x56   : > { %s1768_s19 = scalar_select %p2455_p1, %s1534_s26, %s46_s12  }
  0x57   : > { %p205_p12 = scmp.eq.s32.totalorder %s1075_s2, 3  ;;  %s241_s20 = sand.u32 1, %s1534_s26  }
  0x58   : > { %2456 = sst [smem:[#allocation30_spill]] %s1768_s19  ;;  %p2457_p2 = scmp.eq.s32.totalorder %s1554_s6, 0 }
  0x59   : > { %1138 = dma.hbm_to_vmem [thread:$0]  (!%p1136_p10), %s2454_s3, 192, %s225_s15, [#allocation9], %s1560_s21, %s1560_s21, %s1561_s13  }
  0x5a   : > { %p55_p3 = por %p2457_p2, %p53_p6  ;;  %p1779_p13 = por %p2423_p0, %p59_p9 }
  0x5b   : > { %p2459_p7 = scmp.eq.s32.totalorder %s1737_s14, 3  ;;  %p1789_p10 = por %p205_p12, %p59_p9 }
  0x5c   : > { %s1085_s21 = sshll.u32 %s241_s20, 7  ;;  %s1119_s13 = sshll.u32 %s1546_s29, 4 }
  0x5d   : > { %p1785_p8 = por %p2459_p7, %p53_p6  ;;  %s252_s5 = sadd.s32 %s1119_s13, %s1710_s4 }
  0x5e   : > { %s2461_s16 = scalar_select %p1789_p10, 1, 0 }
  0x5f   : > { %s2460_s15 = scalar_select %p1785_p8, 1, 0 }
  0x60   : > { %s245_s18 = scalar_lea.vmem [#allocation2], %s1085_s21  ;;  %s1089_s12 = sshll.u32 %s252_s5, 7 }
  0x61   : > { %s255_s2 = sshll.u32 %s245_s18, 4  ;;  %s2462_s0 = sld [smem:[#allocation31_spill]]  ;;  %s256_s2 = int_to_ptr.vmem [resolvable:$true] %s255_s2 }
  0x62   : > { %p2463_p11 = scmp.lt.s32.totalorder %s1554_s6, 4  ;;  %s242_s30 = scalar_lea.sflag [#allocation3], %s241_s20 }
  0x63   : > { %s1355_s19 = scalar_lea.vmem %s256_s2, 2048  ;;  %s1562_s21 = smov [#allocation2]  }
  0x64   : > { %p1800_p1 = pnand %p2463_p11, %p55_p3  ;;  %p1356_p9 = scmp.ne.s32.totalorder %s256_s2, %s1355_s19 }
  0x65   : > { %s1360_s13 = sshll.u32 %s1562_s21, 4  ;;  %s1361_s13 = int_to_ptr.vmem [resolvable:$false] %s1360_s13 }
  0x66   : > { %p1344_p6 = pneg %p1800_p1  ;;  %s1362_s5 = scalar_lea.vmem %s1361_s13, 4096 }
  0x67   : > { %s254_s1 = scalar_lea.hbm %s2462_s0, %s1089_s12  ;;  %p1363_p7 = scmp.lt.s32.totalorder %s256_s2, %s1361_s13 }
  0x68   : > { %p1358_p12 = pnand %p1356_p9, %p1344_p6  ;;  %p1364_p0 = scmp.lt.s32.totalorder %s1362_s5, %s1355_s19 }
  0x6a   : > { %p1359_p2 = pneg %p1358_p12  ;;  %p1365_p10 = por %p1364_p0, %p1363_p7 }
  0x6c   : > { %p1366_p8 = pnand %p1365_p10, %p1359_p2 }
  0x6e   : > { %1369 = shalt.err (!%p1366_p8)
}
  0x6f   : > { %s2465_s8 = smov 8   ;;  %s2466_s27 = smov 128  }
  0x70   : > { %s2467_s20 = sld [smem:[#allocation18_spill]]  ;;  %p2473_p3 = scmp.lt.s32.totalorder %s1702_s11, 15 }
  0x71   : > { %s2468_s18 = sld [smem:[#allocation28_spill]]  ;;  %p2474_p11 = scmp.eq.s32.totalorder %s1554_s6, 0 }
  0x72   : > { %s2469_s12 = sld [smem:[#allocation17_spill]]  ;;  %s2519_s11 = smov (!%p2473_p3, %s1702_s11), 15 }
  0x73   : > { %s2470_s21 = sld [smem:[#allocation16_spill]]  ;;  %p2475_p12 = scmp.eq.s32.totalorder %s1737_s14, 0 }
  0x74   : > { %s2471_s13 = sld [smem:[#allocation27_spill]] }
  0x75   : > { %1142 = dma.hbm_to_vmem [thread:$0]  (!%p1800_p1), %s254_s1, 2048, %s256_s2, %s242_s30, %s2466_s27, %s2466_s27, %s2465_s8  }
  0x76   : > { %s118_s3 = sadd.s32 1, %s2467_s20  ;;  %s294_s5 = sand.u32 1, %s2467_s20  }
  0x77   : > { %p2472_p0 = scmp.lt.s32.totalorder %s2468_s18, 15  ;;  %s1096_s1 = sshll.u32 %s294_s5, 4 }
  0x78   : > { %p125_p8 = scmp.ne.s32.totalorder %s2467_s20, %s2469_s12  ;;  %s296_s28 = scalar_lea.vmem [#allocation7], %s1096_s1 }
  0x79   : > { %s2517_s18 = smov (!%p2472_p0, %s2468_s18), 15  ;;  %p131_p10 = scmp.ne.s32.totalorder %s2469_s12, %s2470_s21 }
  0x7a   : > { %s114_s19 = ssub.s32 %s2517_s18, %s2519_s11  ;;  %p127_p6 = por %p125_p8, %p2474_p11 }
  0x7b   : > { %s115_s0 = sor.u32 %s114_s19, %s2471_s13  ;;  %p1828_p2 = por %p131_p10, %p2475_p12 }
  0x7c   : > { %p116_p9 = scmp.eq.s32.totalorder %s115_s0, 0  ;;  %s1098_s30 = sshll.u32 %s2517_s18, 1 }
  0x7d   : > { %s2476_s29 = scalar_select %p1828_p2, 1, 0 }
  0x7e   : > { %s2521_s20 = smov (!%p116_p9, %s2467_s20), %s118_s3  ;;  %s306_s2 = sadd.s32 %s1098_s30, %s1710_s4 }
  0x7f   : > { %s1100_s26 = sshll.u32 %s306_s2, 7  ;;  %s309_s12 = sshll.u32 %s296_s28, 4  ;;  %s310_s12 = int_to_ptr.vmem [resolvable:$true] %s309_s12 }
  0x80   : > { %s2477_s23 = sld [smem:[#allocation33_spill]]  ;;  %p2478_p1 = scmp.lt.s32.totalorder %s1554_s6, 4 }
  0x81   : > { %s1383_s18 = scalar_lea.vmem %s310_s12, 256  ;;  %s1563_s4 = smov [#allocation7]  }
  0x82   : > { %p1841_p7 = pnand %p2478_p1, %p127_p6  ;;  %p1384_p3 = scmp.ne.s32.totalorder %s310_s12, %s1383_s18 }
  0x83   : > { %s1388_s3 = sshll.u32 %s1563_s4, 4  ;;  %s1389_s3 = int_to_ptr.vmem [resolvable:$false] %s1388_s3 }
  0x84   : > { %p1372_p0 = pneg %p1841_p7  ;;  %s1390_s28 = scalar_lea.vmem %s1389_s3, 512 }
  0x85   : > { %p1391_p11 = scmp.lt.s32.totalorder %s310_s12, %s1389_s3  ;;  %p1392_p9 = scmp.lt.s32.totalorder %s1390_s28, %s1383_s18 }
  0x86   : > { %s308_s13 = scalar_lea.hbm %s2477_s23, %s1100_s26  ;;  %p1386_p8 = pnand %p1384_p3, %p1372_p0 }
  0x87   : > { %p1393_p12 = por %p1392_p9, %p1391_p11 }
  0x88   : > { %p1387_p10 = pneg %p1386_p8 }
  0x8a   : > { %p1394_p2 = pnand %p1393_p12, %p1387_p10 }
  0x8c   : > { %1397 = shalt.err (!%p1394_p2)
}
  0x8d   : > { %1148 = dma.hbm_to_vmem [thread:$0]  (!%p1841_p7), %s308_s13, 256, %s310_s12, %s1726_s10, %s2466_s27, %s2466_s27, %s2465_s8  }
  0x8e   : > { %321 = sbr.rel (%p1752_p5) target bundleno = 282 (0x11a), region = 40  ;;  %s1856_s23 = sand.u32 (!%p1752_p5), 1, %s1530_s25  }
  0x8f   : > { %s1102_s26 = sshll.u32 (!%p1752_p5), %s1856_s23, 7  ;;  %s324_s19 = scalar_lea.sflag (!%p1752_p5), [#allocation3], %s1856_s23 }
  0x90   : > { %s1862_s5 = scalar_lea.vmem (!%p1752_p5), [#allocation2], %s1102_s26 }
  0x93   : > { %1481 = dma.done.wait (%p1779_p13), %s324_s19, 2048  }
  0x94   : > { %1483 = vsyncadd (%p1779_p13), %s324_s19, 4294965248  ;;  %s332_s10 = sand.u32 1, %s1737_s14   ;;  %s334_s9 = sand.u32 1, %s1518_s22  }
  0x95   : > { %s1870_s8 = sshll.u32 %s334_s9, 4  ;;  %s333_s27 = scalar_lea.sflag [#allocation6], %s332_s10 }
  0x96   : > { %s336_s1 = scalar_lea.vmem [#allocation5], %s1870_s8 }
  0x97   : > { %1485 = dma.done.wait (%p1748_p4), %s333_s27, 256  }
  0x98   : > { %1487 = vsyncadd (%p1748_p4), %s333_s27, 4294967040  ;;  %s2480_s30 = sld [smem:[#allocation17_spill]]  ;;  %p2481_p5 = scmp.ne.s32.totalorder %s2476_s29, 0 }
  0x9e   : > { %s343_s2 = sand.u32 1, %s2480_s30  }
  0x9f   : > { %s1878_s7 = sshll.u32 %s343_s2, 4 }
  0xa0   : > { %s345_s12 = scalar_lea.vmem [#allocation7], %s1878_s7 }
  0xa1   : > { %1489 = dma.done.wait (%p2481_p5), %s333_s27, 256  }
  0xa2   : > { %1491 = vsyncadd (%p2481_p5), %s333_s27, 4294967040  ;;  %p2482_p13 = scmp.eq.s32.totalorder %s1737_s14, 0 }
  0xa4   : > { %1493 = dma.done.wait (%p2482_p13), [#allocation9], 192   ;;  %p2483_p6 = pmov %p2482_p13 }
  0xa5   : > { %s2484_s17 = sld [smem:[#allocation21_spill]]  ;;  %v432_v0 = vlaneseq  ;;  %v428_v6 = vld [vmem:[#allocation8] sm:$0x7]  ;;  %v429_v8 = vld [vmem:[#allocation8 + $0x4] sm:$0x7]  ;;  %vm746_vm0 = vcmask 1040384  }
  0xa6   : > { %1495 = vsyncadd (%p2483_p6), [#allocation9], 4294967104  ;;  %v1892_v7 = vld [vmem:[%s1862_s5] sm:$0xff]  ;;  %v430_v9 = vld [vmem:[#allocation8 + $0x8] sm:$0x7]  ;;  %s2485_s11 = sld [smem:[#allocation35_spill]] }
  0xa7   : > { %v433_v1 = vshrl.u32 %v432_v0, 7  ;;  %v1914_v19 = vld [vmem:[%s1862_s5 + $0x8] sm:$0xff]  ;;  %v1917_v20 = vld [vmem:[%s1862_s5 + $0x10] sm:$0xff]  ;;  %vm811_vm1 = vcmask 1046528   ;;  %v1932_v29 = vld [vmem:[%s1862_s5 + $0x18] sm:$0xff]  ;;  %s1991_s13 = scalar_lea.vmem [#allocation10], %s1102_s26 }
  0xa8   : > { %v1961_v57 = vld [vmem:[%s1862_s5 + $0x20] sm:$0xff]  ;;  %s2486_s18 = sld [smem:[#allocation22_spill]]  ;;  %s925_s26 = sshll.u32 %s1991_s13, 4  ;;  %s2318_s26 = int_to_ptr.vmem [resolvable:$true] %s925_s26 }
  0xa9   : > { %v434_v2 = vsub.s32 0, %v433_v1  ;;  %v526_v3 = vsub.s32 1, %v433_v1  ;;  %v640_v4 = vsub.s32 2, %v433_v1  ;;  %s2487_s9 = sld [smem:[#allocation36_spill]]  ;;  %s909_s27 = scalar_lea.sflag [#allocation4], %s1856_s23 }
  0xaa   : > { %p2488_p7 = scmp.ne.s32.totalorder %s2460_s15, 0  ;;  %s1564_s30 = smov [#allocation10]  }
  0xab   : > { %p412_p4 = scmp.gt.s32.totalorder %s2484_s17, 0  ;;  %p420_p2 = scmp.lt.s32.totalorder %s2484_s17, 1  ;;  %v1894_v10 = vrot.slane %v428_v6, %v434_v2  ;;  %v1896_v11 = vrot.slane %v428_v6, %v526_v3  ;;  %v1898_v12 = vrot.slane %v428_v6, %v640_v4  ;;  %v1905_v15 = vrot.slane %v429_v8, %v434_v2 }
  0xac   : > { %v1903_v14 = vld [vmem:[%s2485_s11] ss:$0 sm:$0xff]  ;;  %v1907_v16 = vrot.slane %v430_v9, %v434_v2  ;;  %v1909_v17 = vrot.slane %v429_v8, %v526_v3  ;;  %v1911_v18 = vrot.slane %v430_v9, %v526_v3  ;;  %v1935_v31 = vrot.slane %v429_v8, %v640_v4  ;;  %s1122_s4 = sshll.u32 %s2484_s17, 4  ;;  %s1402_s2 = sshll.u32 %s1564_s30, 4  ;;  %s1403_s2 = int_to_ptr.vmem [resolvable:$false] %s1402_s2 }
  0xad   : > { %s1277_s21 = scalar_select %p412_p4, 255, 0  ;;  %v456_v25 = vmul.f32 %v1905_v15, %v1892_v7  ;;  %v1937_v32 = vrot.slane %v430_v9, %v640_v4  ;;  %v457_v35 = vmul.f32 %v1905_v15, %v1914_v19  ;;  %v438_v53 = vmul.f32 %v1894_v10, %v1892_v7 }
  0xae   : > { %v492_v26 = vmul.f32 %v1907_v16, %v1917_v20  ;;  %v570_v27 = vmul.f32 %v1909_v17, %v1892_v7  ;;  %v606_v28 = vmul.f32 %v1911_v18, %v1917_v20  ;;  %v493_v36 = vmul.f32 %v1907_v16, %v1932_v29  ;;  %s2240_s0 = scalar_select %p420_p2, 255, 0 }
  0xaf   : > { %v1278_v5 = vld [vmem:[%s336_s1] sm:%s1277_s21]  ;;  %v1281_v13 = vld [vmem:[%s336_s1 + $0x8] sm:%s1277_s21]  ;;  %v662_v39 = vmul.f32 %v1935_v31, %v1892_v7  ;;  %v663_v40 = vmul.f32 %v1935_v31, %v1914_v19  ;;  %v698_v41 = vmul.f32 %v1937_v32, %v1917_v20  ;;  %v699_v43 = vmul.f32 %v1937_v32, %v1932_v29  ;;  %s1111_s3 = sshll.u32 %s2486_s18, 5  ;;  %s1398_s1 = scalar_lea.vmem %s2318_s26, 2048 }
  0xb0   : > { %v436_v21 = vmul.f32 %v1278_v5, %v1894_v10  ;;  %v528_v22 = vmul.f32 %v1278_v5, %v1896_v11  ;;  %v642_v23 = vmul.f32 %v1278_v5, %v1898_v12  ;;  %v643_v24 = vmul.f32 %v1281_v13, %v1898_v12  ;;  %s922_s28 = sadd.s32 %s1122_s4, %s1111_s3  ;;  %p1399_p1 = scmp.ne.s32.totalorder %s2318_s26, %s1398_s1 }
  0xb1   : > { %v437_v33 = vmul.f32 %v1281_v13, %v1894_v10  ;;  %v529_v37 = vmul.f32 %v1281_v13, %v1896_v11  ;;  %v571_v49 = vmul.f32 %v1909_v17, %v1914_v19  ;;  %v607_v52 = vmul.f32 %v1911_v18, %v1932_v29  ;;  %s1112_s19 = sshll.u32 %s922_s28, 7  ;;  %s1404_s7 = scalar_lea.vmem %s1403_s2, 4096 }
  0xb2   : > { %v550_v30 = vadd.f32 %v1903_v14, %v528_v22  ;;  %v472_v34 = vadd.f32 %v456_v25, %v436_v21  ;;  %v678_v47 = vadd.f32 %v662_v39, %v642_v23  ;;  %v679_v48 = vadd.f32 %v663_v40, %v643_v24  ;;  %s2323_s8 = scalar_lea.hbm %s2487_s9, %s1112_s19  ;;  %p1400_p0 = pnand %p1399_p1, %p2488_p7 }
  0xb3   : > { %v473_v44 = vadd.f32 %v457_v35, %v437_v33  ;;  %v551_v45 = vadd.f32 %v1903_v14, %v529_v37  ;;  %v458_v58 = vmul.f32 %v1905_v15, %v1917_v20  ;;  %v494_v61 = vmul.f32 %v1907_v16, %v1961_v57  ;;  %p1405_p8 = scmp.lt.s32.totalorder %s2318_s26, %s1403_s2  ;;  %p1406_p10 = scmp.lt.s32.totalorder %s1404_s7, %s1398_s1 }
  0xb4   : > { %v586_v38 = vadd.f32 %v570_v27, %v550_v30  ;;  %v508_v42 = vadd.f32 %v492_v26, %v472_v34  ;;  %v714_v54 = vadd.f32 %v698_v41, %v678_v47  ;;  %v715_v55 = vadd.f32 %v699_v43, %v679_v48  ;;  %v1981_v27 = vld [vmem:[%s1862_s5 + $0x28] sm:$0xff]  ;;  %p1401_p3 = pneg %p1400_p0 }
  0xb5   : > { %v509_v51 = vadd.f32 %v493_v36, %v473_v44  ;;  %v587_v56 = vadd.f32 %v571_v49, %v551_v45  ;;  %v530_v62 = vmul.f32 %v1896_v11, %v1892_v7  ;;  %v474_v4 = vadd.f32 %v458_v58, %v438_v53  ;;  %p1407_p11 = por %p1406_p10, %p1405_p8 }
  0xb6   : > { %v622_v46 = vadd.f32 %v606_v28, %v586_v38  ;;  %v747_v50 = vrot.slane %v508_v42, 7  ;;  %v812_v63 = vrot.slane %v714_v54, 1  ;;  %v813_v0 = vrot.slane %v715_v55, 1 }
  0xb7   : > { %v748_v60 = vrot.slane %v509_v51, 7  ;;  %v623_v2 = vadd.f32 %v607_v52, %v587_v56  ;;  %v552_v5 = vadd.f32 %v1903_v14, %v530_v62  ;;  %v572_v6 = vmul.f32 %v1909_v17, %v1917_v20  ;;  %v2014_v51 = vld [vmem:[%s1862_s5 + $0x30] sm:$0xff]  ;;  %p1408_p9 = pnand %p1407_p11, %p1401_p3 }
  0xb8   : > { %v787_v59 = vsel %vm746_vm0, 0.0, %v747_v50  ;;  %v814_v8 = vsel %vm811_vm1, %v812_v63, %v813_v0  ;;  %v852_v9 = vsel %vm811_vm1, %v813_v0, 0.0  ;;  %v608_v21 = vmul.f32 %v1911_v18, %v1961_v57 }
  0xb9   : > { %v860_v1 = vadd.f32 %v787_v59, %v622_v46  ;;  %v749_v3 = vsel %vm746_vm0, %v747_v50, %v748_v60  ;;  %v510_v23 = vadd.f32 %v494_v61, %v474_v4  ;;  %v588_v24 = vadd.f32 %v572_v6, %v552_v5 }
  0xba   : > { %v861_v13 = vadd.f32 %v749_v3, %v623_v2  ;;  %v644_v25 = vmul.f32 %v1898_v12, %v1892_v7  ;;  %v645_v28 = vmul.f32 %v1898_v12, %v1914_v19  ;;  %v664_v30 = vmul.f32 %v1935_v31, %v1917_v20 }
  0xbb   : > { %v876_v22 = vadd.f32 %v860_v1, %v814_v8  ;;  %v665_v33 = vmul.f32 %v1935_v31, %v1932_v29  ;;  %v624_v34 = vadd.f32 %v608_v21, %v588_v24  ;;  %v700_v7 = vmul.f32 %v1937_v32, %v1961_v57 }
  0xbc   : > { %v877_v26 = vadd.f32 %v861_v13, %v852_v9  ;;  %v701_v35 = vmul.f32 %v1937_v32, %v1981_v27  ;;  %v750_v36 = vrot.slane %v510_v23, 7  ;;  %v680_v37 = vadd.f32 %v664_v30, %v644_v25 }
  0xbd   : > { %892 = vst [vmem:[%s1991_s13] sm:$0xff] %v876_v22  ;;  %v681_v38 = vadd.f32 %v665_v33, %v645_v28  ;;  %v439_v39 = vmul.f32 %v1894_v10, %v1914_v19  ;;  %v459_v40 = vmul.f32 %v1905_v15, %v1932_v29  ;;  %v495_v42 = vmul.f32 %v1907_v16, %v1981_v27  ;;  %v2040_v22 = vld [vmem:[%s1862_s5 + $0x38] sm:$0xff] }
  0xbe   : > { %893 = vst [vmem:[%s1991_s13 + $0x8] sm:$0xff] %v877_v26  ;;  %v788_v41 = vsel %vm746_vm0, 0.0, %v750_v36  ;;  %v531_v43 = vmul.f32 %v1896_v11, %v1914_v19  ;;  %v573_v44 = vmul.f32 %v1909_v17, %v1932_v29  ;;  %v716_v45 = vadd.f32 %v700_v7, %v680_v37 }
  0xbf   : > { %v717_v46 = vadd.f32 %v701_v35, %v681_v38  ;;  %v862_v47 = vadd.f32 %v788_v41, %v624_v34  ;;  %v475_v48 = vadd.f32 %v459_v40, %v439_v39  ;;  %v609_v50 = vmul.f32 %v1911_v18, %v1981_v27 }
  0xc0   : > { %v553_v49 = vadd.f32 %v1903_v14, %v531_v43  ;;  %v440_v52 = vmul.f32 %v1894_v10, %v1917_v20  ;;  %v460_v19 = vmul.f32 %v1905_v15, %v1961_v57  ;;  %v815_v53 = vrot.slane %v716_v45, 1 }
  0xc1   : > { %v816_v54 = vrot.slane %v717_v46, 1  ;;  %v511_v55 = vadd.f32 %v495_v42, %v475_v48  ;;  %v496_v56 = vmul.f32 %v1907_v16, %v2014_v51  ;;  %v532_v60 = vmul.f32 %v1896_v11, %v1917_v20 }
  0xc2   : > { %v589_v58 = vadd.f32 %v573_v44, %v553_v49  ;;  %v476_v59 = vadd.f32 %v460_v19, %v440_v52  ;;  %v574_v61 = vmul.f32 %v1909_v17, %v1961_v57  ;;  %v610_v1 = vmul.f32 %v1911_v18, %v2014_v51 }
  0xc3   : > { %v817_v62 = vsel %vm811_vm1, %v815_v53, %v816_v54  ;;  %v751_v63 = vrot.slane %v511_v55, 7  ;;  %v853_v0 = vsel %vm811_vm1, %v816_v54, 0.0  ;;  %v554_v5 = vadd.f32 %v1903_v14, %v532_v60 }
  0xc4   : > { %v878_v2 = vadd.f32 %v862_v47, %v817_v62  ;;  %v625_v3 = vadd.f32 %v609_v50, %v589_v58  ;;  %v512_v4 = vadd.f32 %v496_v56, %v476_v59  ;;  %v646_v8 = vmul.f32 %v1898_v12, %v1917_v20  ;;  %v2064_v47 = vld [vmem:[%s1862_s5 + $0x40] sm:$0xff] }
  0xc5   : > { %v752_v6 = vsel %vm746_vm0, %v750_v36, %v751_v63  ;;  %v647_v9 = vmul.f32 %v1898_v12, %v1932_v29  ;;  %v666_v13 = vmul.f32 %v1935_v31, %v1961_v57  ;;  %v590_v23 = vadd.f32 %v574_v61, %v554_v5 }
  0xc6   : > { %894 = vst [vmem:[%s1991_s13 + $0x10] sm:$0xff] %v878_v2  ;;  %v863_v21 = vadd.f32 %v752_v6, %v625_v3  ;;  %v667_v24 = vmul.f32 %v1935_v31, %v1981_v27  ;;  %v702_v25 = vmul.f32 %v1937_v32, %v2014_v51  ;;  %v703_v20 = vmul.f32 %v1937_v32, %v2040_v22  ;;  %v2090_v6 = vld [vmem:[%s1862_s5 + $0x48] sm:$0xff] }
  0xc7   : > { %v682_v26 = vadd.f32 %v666_v13, %v646_v8  ;;  %v753_v28 = vrot.slane %v512_v4, 7  ;;  %v441_v30 = vmul.f32 %v1894_v10, %v1932_v29  ;;  %v626_v34 = vadd.f32 %v610_v1, %v590_v23 }
  0xc8   : > { %v879_v33 = vadd.f32 %v863_v21, %v853_v0  ;;  %v683_v7 = vadd.f32 %v667_v24, %v647_v9  ;;  %v461_v35 = vmul.f32 %v1905_v15, %v1981_v27  ;;  %v497_v38 = vmul.f32 %v1907_v16, %v2040_v22 }
  0xc9   : > { %v718_v36 = vadd.f32 %v702_v25, %v682_v26  ;;  %v789_v37 = vsel %vm746_vm0, 0.0, %v753_v28  ;;  %v533_v39 = vmul.f32 %v1896_v11, %v1932_v29  ;;  %v575_v43 = vmul.f32 %v1909_v17, %v1981_v27 }
  0xca   : > { %895 = vst [vmem:[%s1991_s13 + $0x18] sm:$0xff] %v879_v33  ;;  %v719_v40 = vadd.f32 %v703_v20, %v683_v7  ;;  %v864_v41 = vadd.f32 %v789_v37, %v626_v34  ;;  %v477_v42 = vadd.f32 %v461_v35, %v441_v30  ;;  %v611_v46 = vmul.f32 %v1911_v18, %v2040_v22 }
  0xcb   : > { %v818_v44 = vrot.slane %v718_v36, 1  ;;  %v555_v45 = vadd.f32 %v1903_v14, %v533_v39  ;;  %v442_v48 = vmul.f32 %v1894_v10, %v1961_v57  ;;  %v462_v50 = vmul.f32 %v1905_v15, %v2014_v51 }
  0xcc   : > { %v819_v49 = vrot.slane %v719_v40, 1  ;;  %v513_v29 = vadd.f32 %v497_v38, %v477_v42  ;;  %v498_v52 = vmul.f32 %v1907_v16, %v2064_v47  ;;  %v534_v53 = vmul.f32 %v1896_v11, %v1961_v57  ;;  %v2114_v42 = vld [vmem:[%s1862_s5 + $0x50] sm:$0xff] }
  0xcd   : > { %v591_v19 = vadd.f32 %v575_v43, %v555_v45  ;;  %v576_v54 = vmul.f32 %v1909_v17, %v2014_v51  ;;  %v612_v55 = vmul.f32 %v1911_v18, %v2064_v47  ;;  %v478_v60 = vadd.f32 %v462_v50, %v442_v48 }
  0xce   : > { %v820_v56 = vsel %vm811_vm1, %v818_v44, %v819_v49  ;;  %v754_v58 = vrot.slane %v513_v29, 7  ;;  %v854_v59 = vsel %vm811_vm1, %v819_v49, 0.0  ;;  %v556_v63 = vadd.f32 %v1903_v14, %v534_v53 }
  0xcf   : > { %v880_v61 = vadd.f32 %v864_v41, %v820_v56  ;;  %v627_v62 = vadd.f32 %v611_v46, %v591_v19  ;;  %v648_v0 = vmul.f32 %v1898_v12, %v1961_v57  ;;  %v514_v2 = vadd.f32 %v498_v52, %v478_v60 }
  0xd0   : > { %v755_v1 = vsel %vm746_vm0, %v753_v28, %v754_v58  ;;  %v649_v3 = vmul.f32 %v1898_v12, %v1981_v27  ;;  %v668_v4 = vmul.f32 %v1935_v31, %v2014_v51  ;;  %v592_v8 = vadd.f32 %v576_v54, %v556_v63 }
  0xd1   : > { %896 = vst [vmem:[%s1991_s13 + $0x20] sm:$0xff] %v880_v61  ;;  %v865_v5 = vadd.f32 %v755_v1, %v627_v62  ;;  %v669_v9 = vmul.f32 %v1935_v31, %v2040_v22  ;;  %v704_v57 = vmul.f32 %v1937_v32, %v2064_v47  ;;  %v705_v21 = vmul.f32 %v1937_v32, %v2090_v6  ;;  %v2140_v1 = vld [vmem:[%s1862_s5 + $0x58] sm:$0xff] }
  0xd2   : > { %v684_v13 = vadd.f32 %v668_v4, %v648_v0  ;;  %v756_v23 = vrot.slane %v514_v2, 7  ;;  %v443_v24 = vmul.f32 %v1894_v10, %v1981_v27  ;;  %v628_v26 = vadd.f32 %v612_v55, %v592_v8 }
  0xd3   : > { %v881_v25 = vadd.f32 %v865_v5, %v854_v59  ;;  %v685_v20 = vadd.f32 %v669_v9, %v649_v3  ;;  %v463_v28 = vmul.f32 %v1905_v15, %v2040_v22  ;;  %v499_v34 = vmul.f32 %v1907_v16, %v2090_v6 }
  0xd4   : > { %v720_v30 = vadd.f32 %v704_v57, %v684_v13  ;;  %v790_v33 = vsel %vm746_vm0, 0.0, %v756_v23  ;;  %v535_v7 = vmul.f32 %v1896_v11, %v1981_v27  ;;  %v577_v38 = vmul.f32 %v1909_v17, %v2040_v22 }
  0xd5   : > { %897 = vst [vmem:[%s1991_s13 + $0x28] sm:$0xff] %v881_v25  ;;  %v721_v35 = vadd.f32 %v705_v21, %v685_v20  ;;  %v866_v36 = vadd.f32 %v790_v33, %v628_v26  ;;  %v479_v37 = vadd.f32 %v463_v28, %v443_v24  ;;  %v613_v41 = vmul.f32 %v1911_v18, %v2090_v6 }
  0xd6   : > { %v821_v39 = vrot.slane %v720_v30, 1  ;;  %v557_v40 = vadd.f32 %v1903_v14, %v535_v7  ;;  %v444_v43 = vmul.f32 %v1894_v10, %v2014_v51  ;;  %v464_v45 = vmul.f32 %v1905_v15, %v2064_v47 }
  0xd7   : > { %v822_v44 = vrot.slane %v721_v35, 1  ;;  %v515_v27 = vadd.f32 %v499_v34, %v479_v37  ;;  %v500_v46 = vmul.f32 %v1907_v16, %v2114_v42  ;;  %v536_v49 = vmul.f32 %v1896_v11, %v2014_v51  ;;  %v2164_v37 = vld [vmem:[%s1862_s5 + $0x60] sm:$0xff] }
  0xd8   : > { %v593_v48 = vadd.f32 %v577_v38, %v557_v40  ;;  %v578_v29 = vmul.f32 %v1909_v17, %v2064_v47  ;;  %v614_v50 = vmul.f32 %v1911_v18, %v2114_v42  ;;  %v480_v54 = vadd.f32 %v464_v45, %v444_v43 }
  0xd9   : > { %v823_v52 = vsel %vm811_vm1, %v821_v39, %v822_v44  ;;  %v757_v19 = vrot.slane %v515_v27, 7  ;;  %v855_v53 = vsel %vm811_vm1, %v822_v44, 0.0  ;;  %v558_v58 = vadd.f32 %v1903_v14, %v536_v49 }
  0xda   : > { %v882_v55 = vadd.f32 %v866_v36, %v823_v52  ;;  %v629_v56 = vadd.f32 %v613_v41, %v593_v48  ;;  %v650_v59 = vmul.f32 %v1898_v12, %v2014_v51  ;;  %v516_v61 = vadd.f32 %v500_v46, %v480_v54 }
  0xdb   : > { %v758_v60 = vsel %vm746_vm0, %v756_v23, %v757_v19  ;;  %v651_v62 = vmul.f32 %v1898_v12, %v2040_v22  ;;  %v670_v63 = vmul.f32 %v1935_v31, %v2064_v47  ;;  %v594_v2 = vadd.f32 %v578_v29, %v558_v58 }
  0xdc   : > { %898 = vst [vmem:[%s1991_s13 + $0x30] sm:$0xff] %v882_v55  ;;  %v867_v0 = vadd.f32 %v758_v60, %v629_v56  ;;  %v671_v3 = vmul.f32 %v1935_v31, %v2090_v6  ;;  %v706_v51 = vmul.f32 %v1937_v32, %v2114_v42  ;;  %v707_v5 = vmul.f32 %v1937_v32, %v2140_v1  ;;  %v2190_v60 = vld [vmem:[%s1862_s5 + $0x68] sm:$0xff] }
  0xdd   : > { %v686_v4 = vadd.f32 %v670_v63, %v650_v59  ;;  %v759_v8 = vrot.slane %v516_v61, 7  ;;  %v445_v9 = vmul.f32 %v1894_v10, %v2040_v22  ;;  %v630_v13 = vadd.f32 %v614_v50, %v594_v2 }
  0xde   : > { %v883_v57 = vadd.f32 %v867_v0, %v855_v53  ;;  %v687_v21 = vadd.f32 %v671_v3, %v651_v62  ;;  %v465_v23 = vmul.f32 %v1905_v15, %v2090_v6  ;;  %v501_v26 = vmul.f32 %v1907_v16, %v2140_v1 }
  0xdf   : > { %v722_v24 = vadd.f32 %v706_v51, %v686_v4  ;;  %v791_v25 = vsel %vm746_vm0, 0.0, %v759_v8  ;;  %v537_v20 = vmul.f32 %v1896_v11, %v2040_v22  ;;  %v579_v34 = vmul.f32 %v1909_v17, %v2090_v6 }
  0xe0   : > { %899 = vst [vmem:[%s1991_s13 + $0x38] sm:$0xff] %v883_v57  ;;  %v723_v28 = vadd.f32 %v707_v5, %v687_v21  ;;  %v868_v30 = vadd.f32 %v791_v25, %v630_v13  ;;  %v481_v33 = vadd.f32 %v465_v23, %v445_v9  ;;  %v615_v36 = vmul.f32 %v1911_v18, %v2140_v1 }
  0xe1   : > { %v824_v7 = vrot.slane %v722_v24, 1  ;;  %v559_v35 = vadd.f32 %v1903_v14, %v537_v20  ;;  %v446_v38 = vmul.f32 %v1894_v10, %v2064_v47  ;;  %v466_v40 = vmul.f32 %v1905_v15, %v2114_v42 }
  0xe2   : > { %v825_v39 = vrot.slane %v723_v28, 1  ;;  %v517_v22 = vadd.f32 %v501_v26, %v481_v33  ;;  %v502_v41 = vmul.f32 %v1907_v16, %v2164_v37  ;;  %v538_v44 = vmul.f32 %v1896_v11, %v2064_v47  ;;  %v2214_v33 = vld [vmem:[%s1862_s5 + $0x70] sm:$0xff] }
  0xe3   : > { %v595_v43 = vadd.f32 %v579_v34, %v559_v35  ;;  %v580_v27 = vmul.f32 %v1909_v17, %v2114_v42  ;;  %v616_v45 = vmul.f32 %v1911_v18, %v2164_v37  ;;  %v482_v29 = vadd.f32 %v466_v40, %v446_v38 }
  0xe4   : > { %v826_v46 = vsel %vm811_vm1, %v824_v7, %v825_v39  ;;  %v760_v48 = vrot.slane %v517_v22, 7  ;;  %v856_v49 = vsel %vm811_vm1, %v825_v39, 0.0  ;;  %v560_v19 = vadd.f32 %v1903_v14, %v538_v44 }
  0xe5   : > { %v884_v50 = vadd.f32 %v868_v30, %v826_v46  ;;  %v631_v52 = vadd.f32 %v615_v36, %v595_v43  ;;  %v652_v53 = vmul.f32 %v1898_v12, %v2064_v47  ;;  %v518_v55 = vadd.f32 %v502_v41, %v482_v29 }
  0xe6   : > { %v761_v54 = vsel %vm746_vm0, %v759_v8, %v760_v48  ;;  %v653_v56 = vmul.f32 %v1898_v12, %v2090_v6  ;;  %v672_v58 = vmul.f32 %v1935_v31, %v2114_v42  ;;  %v596_v61 = vadd.f32 %v580_v27, %v560_v19 }
  0xe7   : > { %900 = vst [vmem:[%s1991_s13 + $0x40] sm:$0xff] %v884_v50  ;;  %v869_v59 = vadd.f32 %v761_v54, %v631_v52  ;;  %v673_v62 = vmul.f32 %v1935_v31, %v2140_v1  ;;  %v708_v47 = vmul.f32 %v1937_v32, %v2164_v37  ;;  %v709_v0 = vmul.f32 %v1937_v32, %v2190_v60  ;;  %v2244_v54 = vld [vmem:[%s1862_s5 + $0x78] sm:$0xff] }
  0xe8   : > { %v688_v63 = vadd.f32 %v672_v58, %v652_v53  ;;  %v762_v2 = vrot.slane %v518_v55, 7  ;;  %v447_v3 = vmul.f32 %v1894_v10, %v2090_v6  ;;  %v632_v4 = vadd.f32 %v616_v45, %v596_v61 }
  0xe9   : > { %v885_v51 = vadd.f32 %v869_v59, %v856_v49  ;;  %v689_v5 = vadd.f32 %v673_v62, %v653_v56  ;;  %v467_v8 = vmul.f32 %v1905_v15, %v2140_v1  ;;  %v503_v13 = vmul.f32 %v1907_v16, %v2190_v60 }
  0xea   : > { %v724_v9 = vadd.f32 %v708_v47, %v688_v63  ;;  %v792_v57 = vsel %vm746_vm0, 0.0, %v762_v2  ;;  %v539_v21 = vmul.f32 %v1896_v11, %v2090_v6  ;;  %v581_v26 = vmul.f32 %v1909_v17, %v2140_v1 }
  0xeb   : > { %901 = vst [vmem:[%s1991_s13 + $0x48] sm:$0xff] %v885_v51  ;;  %v725_v23 = vadd.f32 %v709_v0, %v689_v5  ;;  %v870_v24 = vadd.f32 %v792_v57, %v632_v4  ;;  %v483_v25 = vadd.f32 %v467_v8, %v447_v3  ;;  %v617_v30 = vmul.f32 %v1911_v18, %v2190_v60  ;;  %v1284_v8 = vld [vmem:[%s345_s12] sm:%s2240_s0] }
  0xec   : > { %v827_v20 = vrot.slane %v724_v9, 1  ;;  %v561_v28 = vadd.f32 %v1903_v14, %v539_v21  ;;  %v448_v34 = vmul.f32 %v1894_v10, %v2114_v42  ;;  %v468_v35 = vmul.f32 %v1905_v15, %v2164_v37 }
  0xed   : > { %v828_v7 = vrot.slane %v725_v23, 1  ;;  %v519_v6 = vadd.f32 %v503_v13, %v483_v25  ;;  %v504_v36 = vmul.f32 %v1907_v16, %v2214_v33  ;;  %v540_v39 = vmul.f32 %v1896_v11, %v2114_v42 }
  0xee   : > { %v597_v38 = vadd.f32 %v581_v26, %v561_v28  ;;  %v582_v22 = vmul.f32 %v1909_v17, %v2164_v37  ;;  %v618_v40 = vmul.f32 %v1911_v18, %v2214_v33  ;;  %v484_v27 = vadd.f32 %v468_v35, %v448_v34 }
  0xef   : > { %v829_v41 = vsel %vm811_vm1, %v827_v20, %v828_v7  ;;  %v763_v43 = vrot.slane %v519_v6, 7  ;;  %v857_v44 = vsel %vm811_vm1, %v828_v7, 0.0  ;;  %v562_v48 = vadd.f32 %v1903_v14, %v540_v39 }
  0xf0   : > { %v886_v45 = vadd.f32 %v870_v24, %v829_v41  ;;  %v633_v46 = vadd.f32 %v617_v30, %v597_v38  ;;  %v654_v49 = vmul.f32 %v1898_v12, %v2114_v42  ;;  %v520_v50 = vadd.f32 %v504_v36, %v484_v27 }
  0xf1   : > { %v764_v29 = vsel %vm746_vm0, %v762_v2, %v763_v43  ;;  %v655_v52 = vmul.f32 %v1898_v12, %v2140_v1  ;;  %v674_v19 = vmul.f32 %v1935_v31, %v2164_v37  ;;  %v598_v55 = vadd.f32 %v582_v22, %v562_v48 }
  0xf2   : > { %902 = vst [vmem:[%s1991_s13 + $0x50] sm:$0xff] %v886_v45  ;;  %v871_v53 = vadd.f32 %v764_v29, %v633_v46  ;;  %v675_v42 = vmul.f32 %v1935_v31, %v2190_v60  ;;  %v710_v56 = vmul.f32 %v1937_v32, %v2214_v33  ;;  %v711_v59 = vmul.f32 %v1937_v32, %v2244_v54  ;;  %v1287_v29 = vld [vmem:[%s345_s12 + $0x8] sm:%s2240_s0] }
  0xf3   : > { %v690_v58 = vadd.f32 %v674_v19, %v654_v49  ;;  %v765_v61 = vrot.slane %v520_v50, 7  ;;  %v449_v62 = vmul.f32 %v1894_v10, %v2140_v1  ;;  %v634_v63 = vadd.f32 %v618_v40, %v598_v55 }
  0xf4   : > { %v887_v47 = vadd.f32 %v871_v53, %v857_v44  ;;  %v691_v0 = vadd.f32 %v675_v42, %v655_v52  ;;  %v469_v2 = vmul.f32 %v1905_v15, %v2190_v60  ;;  %v505_v4 = vmul.f32 %v1907_v16, %v2244_v54 }
  0xf5   : > { %v726_v3 = vadd.f32 %v710_v56, %v690_v58  ;;  %v793_v51 = vsel %vm746_vm0, 0.0, %v765_v61  ;;  %v541_v5 = vmul.f32 %v1896_v11, %v2140_v1  ;;  %v583_v21 = vmul.f32 %v1909_v17, %v2190_v60 }
  0xf6   : > { %903 = vst [vmem:[%s1991_s13 + $0x58] sm:$0xff] %v887_v47  ;;  %v727_v9 = vadd.f32 %v711_v59, %v691_v0  ;;  %v872_v57 = vadd.f32 %v793_v51, %v634_v63  ;;  %v485_v13 = vadd.f32 %v469_v2, %v449_v62  ;;  %v619_v25 = vmul.f32 %v1911_v18, %v2244_v54 }
  0xf7   : > { %v830_v23 = vrot.slane %v726_v3, 1  ;;  %v563_v24 = vadd.f32 %v1903_v14, %v541_v5  ;;  %v450_v26 = vmul.f32 %v1894_v10, %v2164_v37  ;;  %v470_v28 = vmul.f32 %v1905_v15, %v2214_v33 }
  0xf8   : > { %v831_v20 = vrot.slane %v727_v9, 1  ;;  %v521_v1 = vadd.f32 %v505_v4, %v485_v13  ;;  %v506_v30 = vmul.f32 %v1284_v8, %v1907_v16  ;;  %v542_v7 = vmul.f32 %v1896_v11, %v2164_v37 }
  0xf9   : > { %v599_v34 = vadd.f32 %v583_v21, %v563_v24  ;;  %v584_v6 = vmul.f32 %v1909_v17, %v2214_v33  ;;  %v620_v35 = vmul.f32 %v1284_v8, %v1911_v18  ;;  %v486_v22 = vadd.f32 %v470_v28, %v450_v26 }
  0xfa   : > { %v832_v36 = vsel %vm811_vm1, %v830_v23, %v831_v20  ;;  %v766_v38 = vrot.slane %v521_v1, 7  ;;  %v858_v39 = vsel %vm811_vm1, %v831_v20, 0.0  ;;  %v564_v43 = vadd.f32 %v1903_v14, %v542_v7 }
  0xfb   : > { %v888_v40 = vadd.f32 %v872_v57, %v832_v36  ;;  %v635_v41 = vadd.f32 %v619_v25, %v599_v34  ;;  %v656_v44 = vmul.f32 %v1898_v12, %v2164_v37  ;;  %v522_v45 = vadd.f32 %v506_v30, %v486_v22 }
  0xfc   : > { %v767_v27 = vsel %vm746_vm0, %v765_v61, %v766_v38  ;;  %v657_v46 = vmul.f32 %v1898_v12, %v2190_v60  ;;  %v676_v48 = vmul.f32 %v1935_v31, %v2214_v33  ;;  %v600_v50 = vadd.f32 %v584_v6, %v564_v43 }
  0xfd   : > { %904 = vst [vmem:[%s1991_s13 + $0x60] sm:$0xff] %v888_v40  ;;  %v873_v49 = vadd.f32 %v767_v27, %v635_v41  ;;  %v677_v52 = vmul.f32 %v1935_v31, %v2244_v54  ;;  %v712_v37 = vmul.f32 %v1284_v8, %v1937_v32  ;;  %v713_v53 = vmul.f32 %v1287_v29, %v1937_v32 }
  0xfe   : > { %v692_v19 = vadd.f32 %v676_v48, %v656_v44  ;;  %v768_v12 = vrot.slane %v522_v45, 7  ;;  %v451_v33 = vmul.f32 %v1894_v10, %v2190_v60  ;;  %v636_v42 = vadd.f32 %v620_v35, %v600_v50 }
  0xff   : > { %v889_v55 = vadd.f32 %v873_v49, %v858_v39  ;;  %v693_v56 = vadd.f32 %v677_v52, %v657_v46  ;;  %v471_v58 = vmul.f32 %v1905_v15, %v2244_v54  ;;  %v507_v61 = vmul.f32 %v1287_v29, %v1907_v16 }
 0x100   : > { %v728_v59 = vadd.f32 %v712_v37, %v692_v19  ;;  %v794_v31 = vsel %vm746_vm0, 0.0, %v768_v12  ;;  %v543_v62 = vmul.f32 %v1896_v11, %v2190_v60  ;;  %v585_v10 = vmul.f32 %v1909_v17, %v2244_v54 }
 0x101   : > { %905 = vst [vmem:[%s1991_s13 + $0x68] sm:$0xff] %v889_v55  ;;  %v729_v32 = vadd.f32 %v713_v53, %v693_v56  ;;  %v487_v47 = vadd.f32 %v471_v58, %v451_v33  ;;  %v874_v15 = vadd.f32 %v794_v31, %v636_v42  ;;  %v621_v2 = vmul.f32 %v1287_v29, %v1911_v18 }
 0x102   : > { %v833_v63 = vrot.slane %v728_v59, 1  ;;  %v565_v0 = vadd.f32 %v1903_v14, %v543_v62 }
 0x103   : > { %v834_v16 = vrot.slane %v729_v32, 1  ;;  %v523_v3 = vadd.f32 %v507_v61, %v487_v47 }
 0x104   : > { %v601_v11 = vadd.f32 %v585_v10, %v565_v0 }
 0x105   : > { %v835_v60 = vsel %vm811_vm1, %v833_v63, %v834_v16  ;;  %v769_v51 = vrot.slane %v523_v3, 7  ;;  %v859_v5 = vsel %vm811_vm1, %v834_v16, 0.0 }
 0x106   : > { %v890_v17 = vadd.f32 %v874_v15, %v835_v60  ;;  %v637_v54 = vadd.f32 %v621_v2, %v601_v11 }
 0x107   : > { %v770_v4 = vsel %vm746_vm0, %v768_v12, %v769_v51 }
 0x108   : > { %906 = vst [vmem:[%s1991_s13 + $0x70] sm:$0xff] %v890_v17  ;;  %v875_v14 = vadd.f32 %v770_v4, %v637_v54 }
 0x10a   : > { %v891_v18 = vadd.f32 %v875_v14, %v859_v5 }
 0x10c   : > { %907 = vst [vmem:[%s1991_s13 + $0x78] sm:$0xff] %v891_v18 }
 0x10d   : > { %1411 = shalt.err (!%p1408_p9)
}
 0x10e   : > { %s1412_s12 = scalar_lea.hbm %s2323_s8, 2048  ;;  %s1416_s29 = scalar_lea.hbm %s2487_s9, 8192 }
 0x10f   : > { %p1413_p12 = scmp.ne.s32.totalorder %s2323_s8, %s1412_s12  ;;  %p1417_p6 = scmp.lt.s32.totalorder %s2323_s8, %s2487_s9 }
 0x110   : > { %p1418_p4 = scmp.lt.s32.totalorder %s1416_s29, %s1412_s12 }
 0x111   : > { %p1414_p5 = pnand %p1413_p12, %p2488_p7 }
 0x112   : > { %p1419_p2 = por %p1418_p4, %p1417_p6 }
 0x113   : > { %p1415_p13 = pneg %p1414_p5 }
 0x115   : > { %p1420_p1 = pnand %p1419_p2, %p1415_p13 }
 0x117   : > { %1423 = shalt.err (!%p1420_p1)
}
 0x118   : > { %s1565_s13 = smov 128   ;;  %s1566_s0 = smov 8  }
 0x119   : > { %1133 = dma.vmem_to_hbm [thread:$0]  (%p2488_p7), %s2318_s26, 2048, %s2323_s8, %s909_s27, %s1565_s13, %s1565_s13, %s1566_s0  }
 0x11a PF: > { %p1156_p0 = scmp.ge.s32.totalorder %s1554_s6, 2  ;;  %s940_s18 = sand.u32 1, %s1526_s24  }
 0x11b   : > { %p2489_p3 = scmp.ne.s32.totalorder %s2461_s16, 0  ;;  %s941_s4 = scalar_lea.sflag [#allocation4], %s940_s18 }
 0x11d   : > { %p1150_p8 = pnand %p1156_p0, %p2489_p3 }
 0x11f   : > { %p1151_p10 = pneg %p1150_p8 }
 0x121   : > { %1497 = dma.done.wait (%p1151_p10), %s941_s4, 2048  }
 0x122   : > { %1499 = vsyncadd (%p1151_p10), %s941_s4, 4294965248  ;;  %s25_s6 = sadd.s32 1, %s1554_s6   ;;  %s2491_s18 = sld [smem:[#allocation17_spill]] }
 0x123   : > { %p2354_p11 = scmp.ge.s32.totalorder %s25_s6, 6   ;;  %s2492_s19 = sld [smem:[#allocation18_spill]] }
 0x124   : > { %s2493_s15 = sld [smem:[#allocation19_spill]]  ;;  %s2501_s21 = smov %s1518_s22 }
 0x125   : > { %s2494_s23 = sld [smem:[#allocation29_spill]]  ;;  %s2503_s24 = smov %s1530_s25 }
 0x126   : > { %s2495_s28 = sld [smem:[#allocation20_spill]] }
 0x127   : > { %s2496_s26 = sld [smem:[#allocation30_spill]] }
 0x128   : > { %s2497_s27 = sld [smem:[#allocation23_spill]] }
 0x129   : > { %s2498_s16 = sld [smem:[#allocation24_spill]] }
 0x12a   : > { %s2499_s29 = sld [smem:[#allocation25_spill]]  ;;  %s2502_s22 = smov %s2493_s15 }
 0x12b   : > { %s2500_s30 = sld [smem:[#allocation26_spill]]  ;;  %24 = sbr.rel (!%p2354_p11) target bundleno = 20 (0x14), region = 113 }
 0x12c   : > { %s2504_s25 = smov %s2495_s28 }
 0x12f   : > { %s2505_s28 = smov %s2498_s16 }
 0x130   :  { %946 = vsyncpa [#allocation3], 1 }
 0x131   :  { %948 = vsyncpa [#allocation3 + $0x1], 1 }
 0x132   :  { %949 = vsyncpa [#allocation6], 1 }
 0x133   :  { %951 = vsyncpa [#allocation6 + $0x1], 1 }
 0x134   :  { %952 = vsyncpa [#allocation9], 1 }
 0x135   :  { %953 = vsyncpa [#allocation4], 1 }
 0x136   :  { %955 = vsyncpa [#allocation4 + $0x1], 1 }

</bundles_post_ra>
